<compile_context>
chip_gen: v5e
topology: v5e:2x2
jax: 0.10.0
libtpu: 0.0.40
codegen_flags: <defaults>
</compile_context>

<pallas_src>
import jax
import jax.numpy as jnp
import numpy as np
from jax.experimental import pallas as pl
from jax.experimental.pallas import tpu as pltpu


def _self_attention_kernel(x_ref, wq_ref, wk_ref, wv_ref, wo_ref, bo_ref, o_ref):
    H, C, d = wq_ref.shape
    N = x_ref.shape[1]

    # Per-batch token block; cast to bf16 in-kernel (single f32 HBM read).
    x = x_ref[0].astype(jnp.bfloat16)                      # (N, C)
    # Head-batched copy of x so every matmul below is a plain leading-batch
    # einsum (no lane-dim reshapes/transposes anywhere in the kernel).
    xb = jnp.broadcast_to(x, (H, N, C))                    # (H, N, C)

    # Head-batched Q/K/V projections. The softmax scale is already folded into
    # wq (done once in prepare_params, in f32, before the bf16 cast). Each f32
    # accumulator is cast to bf16 immediately so it dies per-operand.
    q = jnp.einsum('hnc,hcd->hnd', xb, wq_ref[...],
                   preferred_element_type=jnp.float32).astype(jnp.bfloat16)
    k = jnp.einsum('hnc,hcd->hnd', xb, wk_ref[...],
                   preferred_element_type=jnp.float32).astype(jnp.bfloat16)
    v = jnp.einsum('hnc,hcd->hnd', xb, wv_ref[...],
                   preferred_element_type=jnp.float32).astype(jnp.bfloat16)

    # Attention scores + softmax in f32 on VPU/EUP (no `* scale` — folded).
    s = jnp.einsum('hqd,hkd->hqk', q, k,
                   preferred_element_type=jnp.float32)     # (H, N, N)
    s = s - jnp.max(s, axis=-1, keepdims=True)
    p = jnp.exp(s)
    # EUP approximate reciprocal (~1e-3 rel err): fine for inference; use an
    # exact divide for training.
    p = p * pl.reciprocal(jnp.sum(p, axis=-1, keepdims=True), approx=True)
    # TODO(synk): attention dropout would mask `p` here (training only).

    # Weighted values, then the output projection done per head and summed over
    # the leading head axis — replaces the head concat + single (N, hidden)
    # matmul without any lane-offset slices or relayouts.
    o = jnp.einsum('hqk,hkd->hqd', p.astype(jnp.bfloat16), v,
                   preferred_element_type=jnp.float32).astype(jnp.bfloat16)
    per_head = jnp.einsum('hnd,hdc->hnc', o, wo_ref[...],
                          preferred_element_type=jnp.float32)  # (H, N, C)
    out = jnp.sum(per_head, axis=0) + bo_ref[...]              # (N, C) f32
    o_ref[0] = out.astype(o_ref.dtype)


def prepare_params(wq, wk, wv, wo, bo, *, nheads, att_dim):
    """One-time (init-time) weight preparation — hoisted out of the forward.

    wq/wk/wv: (indim, H*d) with head-major columns (matches the module's
    Rearrange). wo: (H*d, indim). bo: (indim,).
    Returns head-major bf16 blocks; softmax scale folded into wq in f32.
    """
    C = wq.shape[0]
    hidden = nheads * att_dim
    scale = float(hidden) ** -0.5          # matches the module: hidden_dim ** -0.5

    def to_heads(w):                        # (C, H*d) -> (H, C, d)
        return jnp.transpose(w.reshape(C, nheads, att_dim), (1, 0, 2))

    return dict(
        wq=(to_heads(wq) * scale).astype(jnp.bfloat16),   # scale folded into Q
        wk=to_heads(wk).astype(jnp.bfloat16),
        wv=to_heads(wv).astype(jnp.bfloat16),
        wo=wo.reshape(nheads, att_dim, C).astype(jnp.bfloat16),  # (H, d, C)
        bo=bo.reshape(1, C).astype(jnp.float32),
    )


def self_attention(x, params):
    """x: (B, N, indim) f32/bf16. params: output of prepare_params()."""
    B, N, C = x.shape
    H, _, d = params['wq'].shape
    hidden = H * d

    flops = (2 * B * N * C * 3 * hidden          # Q/K/V projections
             + 4 * B * H * N * N * d             # scores + weighted sum
             + 2 * B * N * hidden * C)           # output projection
    bytes_accessed = (x.size * x.dtype.itemsize
                      + 2 * (params['wq'].size + params['wk'].size
                             + params['wv'].size + params['wo'].size)
                      + 4 * params['bo'].size
                      + B * N * C * x.dtype.itemsize)
    cost = pl.CostEstimate(flops=flops, transcendentals=B * H * N * N,
                           bytes_accessed=bytes_accessed)

    return pl.pallas_call(
        _self_attention_kernel,
        out_shape=jax.ShapeDtypeStruct((B, N, C), x.dtype),
        grid=(B,),
        in_specs=[
            pl.BlockSpec((1, N, C), lambda b: (b, 0, 0)),      # x (per batch)
            pl.BlockSpec((H, C, d), lambda b: (0, 0, 0)),      # Wq (scaled)
            pl.BlockSpec((H, C, d), lambda b: (0, 0, 0)),      # Wk
            pl.BlockSpec((H, C, d), lambda b: (0, 0, 0)),      # Wv
            pl.BlockSpec((H, d, C), lambda b: (0, 0, 0)),      # Wo
            pl.BlockSpec((1, C), lambda b: (0, 0)),            # out bias
        ],
        out_specs=pl.BlockSpec((1, N, C), lambda b: (b, 0, 0)),
        compiler_params=pltpu.CompilerParams(
            dimension_semantics=("parallel",),
            # Safe on all generations (<= v7x's 64 MiB physical); raise toward
            # 96-128 MiB on v5e/v6e at real ViT sizes, tile flash-style on v7x.
            vmem_limit_bytes=48 * 1024 * 1024),
        cost_estimate=cost,
    )(x, params['wq'], params['wk'], params['wv'], params['wo'], params['bo'])


def _reference(x, wq, wk, wv, wo, bo, *, nheads, att_dim):
    """Pure-f32 reference matching the PyTorch module's forward."""
    B, N, C = x.shape
    hidden = nheads * att_dim
    scale = float(hidden) ** -0.5

    def split_heads(y):  # (B, N, H*d) -> (B, H, N, d), head-major split
        return y.reshape(B, N, nheads, att_dim).transpose(0, 2, 1, 3)

    q = split_heads(jnp.einsum("bnc,ch->bnh", x, wq))
    k = split_heads(jnp.einsum("bnc,ch->bnh", x, wk))
    v = split_heads(jnp.einsum("bnc,ch->bnh", x, wv))
    s = jnp.einsum("bhnd,bhmd->bhnm", q, k) * scale
    p = jax.nn.softmax(s, axis=-1)
    w = jnp.einsum("bhnm,bhmd->bhnd", p, v)
    w = w.transpose(0, 2, 1, 3).reshape(B, N, hidden)
    return jnp.einsum("bnh,hc->bnc", w, wo) + bo


if __name__ == "__main__":
    # Small shapes consistent with the module.
    B, N = 2, 8          # batch, sequence length (tokens)
    indim = 32           # token embedding dim
    att_dim = 16         # per-head dim
    nheads = 4
    hidden_dim = att_dim * nheads

    key = jax.random.PRNGKey(0)
    kx, kq, kk, kv, ko, kb = jax.random.split(key, 6)

    x = jax.random.normal(kx, (B, N, indim), dtype=jnp.float32)
    # Linear weights stored as (in_features, out_features), deterministic init.
    wq = jax.random.normal(kq, (indim, hidden_dim), dtype=jnp.float32) * 0.05
    wk = jax.random.normal(kk, (indim, hidden_dim), dtype=jnp.float32) * 0.05
    wv = jax.random.normal(kv, (indim, hidden_dim), dtype=jnp.float32) * 0.05
    wo = jax.random.normal(ko, (hidden_dim, indim), dtype=jnp.float32) * 0.05
    bo = jax.random.normal(kb, (indim,), dtype=jnp.float32) * 0.05

    # Weight prep is done once (init-time), not per forward.
    params = prepare_params(wq, wk, wv, wo, bo, nheads=nheads, att_dim=att_dim)

    out = self_attention(x, params)
    out = jax.block_until_ready(out)

    ref = _reference(x, wq, wk, wv, wo, bo, nheads=nheads, att_dim=att_dim)
    assert out.shape == (B, N, indim)
    # Looser tolerance vs. the pure-f32 reference accounts for bf16 MXU
    # operands (accumulation stays f32) and the approximate reciprocal.
    np.testing.assert_allclose(np.asarray(out), np.asarray(ref),
                               rtol=2e-2, atol=2e-2)

    print("KERNEL_OK")
</pallas_src>

<mosaic_0001>
module attributes {stable_mosaic.version = 11 : i64} {
  func.func @_self_attention_kernel(%arg0: i32, %arg1: memref<1x8x32xf32, #tpu.memory_space<vmem>>, %arg2: memref<4x32x16xbf16, #tpu.memory_space<vmem>>, %arg3: memref<4x32x16xbf16, #tpu.memory_space<vmem>>, %arg4: memref<4x32x16xbf16, #tpu.memory_space<vmem>>, %arg5: memref<4x16x32xbf16, #tpu.memory_space<vmem>>, %arg6: memref<1x32xf32, #tpu.memory_space<vmem>>, %arg7: memref<1x8x32xf32, #tpu.memory_space<vmem>>) attributes {dimension_semantics = [#tpu.dimension_semantics<parallel>], iteration_bounds = array<i64: 2>, scalar_prefetch = 0 : i64, scratch_operands = 0 : i64, tpu.core_type = #tpu.core_type<tc>, window_params = [{transform_indices = @transform_0, window_bounds = array<i64: 1, 8, 32>}, {pipeline_mode = #tpu.pipeline_mode<synchronous>, transform_indices = @transform_1, window_bounds = array<i64: 4, 32, 16>}, {pipeline_mode = #tpu.pipeline_mode<synchronous>, transform_indices = @transform_2, window_bounds = array<i64: 4, 32, 16>}, {pipeline_mode = #tpu.pipeline_mode<synchronous>, transform_indices = @transform_3, window_bounds = array<i64: 4, 32, 16>}, {pipeline_mode = #tpu.pipeline_mode<synchronous>, transform_indices = @transform_4, window_bounds = array<i64: 4, 16, 32>}, {pipeline_mode = #tpu.pipeline_mode<synchronous>, transform_indices = @transform_5, window_bounds = array<i64: 1, 32>}, {transform_indices = @transform_6, window_bounds = array<i64: 1, 8, 32>}]} {
    %c0 = arith.constant 0 : index
    %c0_0 = arith.constant 0 : index
    %c0_1 = arith.constant 0 : index
    %0 = vector.load %arg1[%c0, %c0_0, %c0_1] : memref<1x8x32xf32, #tpu.memory_space<vmem>>, vector<1x8x32xf32>
    %1 = vector.shape_cast %0 : vector<1x8x32xf32> to vector<8x32xf32>
    %2 = arith.truncf %1 : vector<8x32xf32> to vector<8x32xbf16>
    %3 = vector.shape_cast %2 : vector<8x32xbf16> to vector<1x8x32xbf16>
    %4 = vector.broadcast %3 : vector<1x8x32xbf16> to vector<4x8x32xbf16>
    %c0_2 = arith.constant 0 : index
    %c0_3 = arith.constant 0 : index
    %c0_4 = arith.constant 0 : index
    %5 = vector.load %arg2[%c0_2, %c0_3, %c0_4] : memref<4x32x16xbf16, #tpu.memory_space<vmem>>, vector<4x32x16xbf16>
    "tpu.trace_start"() <{level = 10 : i32, message = "hnc,hcd->hnd"}> : () -> ()
    %cst = arith.constant dense<0.000000e+00> : vector<4x8x16xf32>
    %6 = tpu.matmul %4, %5, %cst {dimension_numbers = #tpu.dot_dimension_numbers<[2], [1], [1], [2], [0, 0, 0, 1, 1, 2], [0], [0]>} : vector<4x8x32xbf16>, vector<4x32x16xbf16>, vector<4x8x16xf32> -> vector<4x8x16xf32>
    "tpu.trace_stop"() : () -> ()
    %7 = arith.truncf %6 : vector<4x8x16xf32> to vector<4x8x16xbf16>
    %c0_5 = arith.constant 0 : index
    %c0_6 = arith.constant 0 : index
    %c0_7 = arith.constant 0 : index
    %8 = vector.load %arg3[%c0_5, %c0_6, %c0_7] : memref<4x32x16xbf16, #tpu.memory_space<vmem>>, vector<4x32x16xbf16>
    "tpu.trace_start"() <{level = 10 : i32, message = "hnc,hcd->hnd"}> : () -> ()
    %cst_8 = arith.constant dense<0.000000e+00> : vector<4x8x16xf32>
    %9 = tpu.matmul %4, %8, %cst_8 {dimension_numbers = #tpu.dot_dimension_numbers<[2], [1], [1], [2], [0, 0, 0, 1, 1, 2], [0], [0]>} : vector<4x8x32xbf16>, vector<4x32x16xbf16>, vector<4x8x16xf32> -> vector<4x8x16xf32>
    "tpu.trace_stop"() : () -> ()
    %10 = arith.truncf %9 : vector<4x8x16xf32> to vector<4x8x16xbf16>
    %c0_9 = arith.constant 0 : index
    %c0_10 = arith.constant 0 : index
    %c0_11 = arith.constant 0 : index
    %11 = vector.load %arg4[%c0_9, %c0_10, %c0_11] : memref<4x32x16xbf16, #tpu.memory_space<vmem>>, vector<4x32x16xbf16>
    "tpu.trace_start"() <{level = 10 : i32, message = "hnc,hcd->hnd"}> : () -> ()
    %cst_12 = arith.constant dense<0.000000e+00> : vector<4x8x16xf32>
    %12 = tpu.matmul %4, %11, %cst_12 {dimension_numbers = #tpu.dot_dimension_numbers<[2], [1], [1], [2], [0, 0, 0, 1, 1, 2], [0], [0]>} : vector<4x8x32xbf16>, vector<4x32x16xbf16>, vector<4x8x16xf32> -> vector<4x8x16xf32>
    "tpu.trace_stop"() : () -> ()
    %13 = arith.truncf %12 : vector<4x8x16xf32> to vector<4x8x16xbf16>
    "tpu.trace_start"() <{level = 10 : i32, message = "hqd,hkd->hqk"}> : () -> ()
    %cst_13 = arith.constant dense<0.000000e+00> : vector<4x8x8xf32>
    %14 = tpu.matmul %7, %10, %cst_13 {dimension_numbers = #tpu.dot_dimension_numbers<[2], [2], [1], [1], [0, 0, 0, 1, 1, 1], [0], [0]>} : vector<4x8x16xbf16>, vector<4x8x16xbf16>, vector<4x8x8xf32> -> vector<4x8x8xf32>
    "tpu.trace_stop"() : () -> ()
    %cst_14 = arith.constant dense<0xFF800000> : vector<4x8xf32>
    %15 = vector.multi_reduction <maximumf>, %14, %cst_14 [2] : vector<4x8x8xf32> to vector<4x8xf32>
    %16 = vector.shape_cast %15 : vector<4x8xf32> to vector<4x8x1xf32>
    %17 = vector.broadcast %16 : vector<4x8x1xf32> to vector<4x8x8xf32>
    %18 = arith.subf %14, %17 : vector<4x8x8xf32>
    %19 = math.exp %18 : vector<4x8x8xf32>
    %cst_15 = arith.constant dense<0.000000e+00> : vector<4x8xf32>
    %20 = vector.multi_reduction <add>, %19, %cst_15 [2] : vector<4x8x8xf32> to vector<4x8xf32>
    %21 = vector.shape_cast %20 : vector<4x8xf32> to vector<4x8x1xf32>
    %22 = tpu.reciprocal %21 {approx = true} : vector<4x8x1xf32> -> vector<4x8x1xf32>
    %23 = vector.broadcast %22 : vector<4x8x1xf32> to vector<4x8x8xf32>
    %24 = arith.mulf %19, %23 : vector<4x8x8xf32>
    %25 = arith.truncf %24 : vector<4x8x8xf32> to vector<4x8x8xbf16>
    "tpu.trace_start"() <{level = 10 : i32, message = "hqk,hkd->hqd"}> : () -> ()
    %cst_16 = arith.constant dense<0.000000e+00> : vector<4x8x16xf32>
    %26 = tpu.matmul %25, %13, %cst_16 {dimension_numbers = #tpu.dot_dimension_numbers<[2], [1], [1], [2], [0, 0, 0, 1, 1, 2], [0], [0]>} : vector<4x8x8xbf16>, vector<4x8x16xbf16>, vector<4x8x16xf32> -> vector<4x8x16xf32>
    "tpu.trace_stop"() : () -> ()
    %27 = arith.truncf %26 : vector<4x8x16xf32> to vector<4x8x16xbf16>
    %c0_17 = arith.constant 0 : index
    %c0_18 = arith.constant 0 : index
    %c0_19 = arith.constant 0 : index
    %28 = vector.load %arg5[%c0_17, %c0_18, %c0_19] : memref<4x16x32xbf16, #tpu.memory_space<vmem>>, vector<4x16x32xbf16>
    "tpu.trace_start"() <{level = 10 : i32, message = "hnd,hdc->hnc"}> : () -> ()
    %cst_20 = arith.constant dense<0.000000e+00> : vector<4x8x32xf32>
    %29 = tpu.matmul %27, %28, %cst_20 {dimension_numbers = #tpu.dot_dimension_numbers<[2], [1], [1], [2], [0, 0, 0, 1, 1, 2], [0], [0]>} : vector<4x8x16xbf16>, vector<4x16x32xbf16>, vector<4x8x32xf32> -> vector<4x8x32xf32>
    "tpu.trace_stop"() : () -> ()
    %cst_21 = arith.constant dense<0.000000e+00> : vector<8x32xf32>
    %30 = vector.multi_reduction <add>, %29, %cst_21 [0] : vector<4x8x32xf32> to vector<8x32xf32>
    %c0_22 = arith.constant 0 : index
    %c0_23 = arith.constant 0 : index
    %31 = vector.load %arg6[%c0_22, %c0_23] : memref<1x32xf32, #tpu.memory_space<vmem>>, vector<1x32xf32>
    %32 = vector.broadcast %31 : vector<1x32xf32> to vector<8x32xf32>
    %33 = arith.addf %30, %32 : vector<8x32xf32>
    %c0_24 = arith.constant 0 : index
    %c0_25 = arith.constant 0 : index
    %c0_26 = arith.constant 0 : index
    %34 = vector.load %arg7[%c0_24, %c0_25, %c0_26] : memref<1x8x32xf32, #tpu.memory_space<vmem>>, vector<1x8x32xf32>
    %35 = vector.shape_cast %34 : vector<1x8x32xf32> to vector<8x32xf32>
    %36 = vector.shape_cast %33 : vector<8x32xf32> to vector<1x8x32xf32>
    tpu.vector_store %arg7[%c0_24, %c0_25, %c0_26], %36 {strides = array<i32>} : memref<1x8x32xf32, #tpu.memory_space<vmem>>, vector<1x8x32xf32>,
    return
  }
  func.func @transform_0(%arg0: i32) -> (i32, i32, i32) {
    %c0_i32 = arith.constant 0 : i32
    %c0_i32_0 = arith.constant 0 : i32
    %c0_i32_1 = arith.constant 0 : i32
    return %arg0, %c0_i32, %c0_i32_0 : i32, i32, i32
  }
  func.func @transform_1(%arg0: i32) -> (i32, i32, i32) {
    %c0_i32 = arith.constant 0 : i32
    %c0_i32_0 = arith.constant 0 : i32
    %c0_i32_1 = arith.constant 0 : i32
    %c0_i32_2 = arith.constant 0 : i32
    return %c0_i32, %c0_i32_0, %c0_i32_1 : i32, i32, i32
  }
  func.func @transform_2(%arg0: i32) -> (i32, i32, i32) {
    %c0_i32 = arith.constant 0 : i32
    %c0_i32_0 = arith.constant 0 : i32
    %c0_i32_1 = arith.constant 0 : i32
    %c0_i32_2 = arith.constant 0 : i32
    return %c0_i32, %c0_i32_0, %c0_i32_1 : i32, i32, i32
  }
  func.func @transform_3(%arg0: i32) -> (i32, i32, i32) {
    %c0_i32 = arith.constant 0 : i32
    %c0_i32_0 = arith.constant 0 : i32
    %c0_i32_1 = arith.constant 0 : i32
    %c0_i32_2 = arith.constant 0 : i32
    return %c0_i32, %c0_i32_0, %c0_i32_1 : i32, i32, i32
  }
  func.func @transform_4(%arg0: i32) -> (i32, i32, i32) {
    %c0_i32 = arith.constant 0 : i32
    %c0_i32_0 = arith.constant 0 : i32
    %c0_i32_1 = arith.constant 0 : i32
    %c0_i32_2 = arith.constant 0 : i32
    return %c0_i32, %c0_i32_0, %c0_i32_1 : i32, i32, i32
  }
  func.func @transform_5(%arg0: i32) -> (i32, i32) {
    %c0_i32 = arith.constant 0 : i32
    %c0_i32_0 = arith.constant 0 : i32
    %c0_i32_1 = arith.constant 0 : i32
    return %c0_i32, %c0_i32_0 : i32, i32
  }
  func.func @transform_6(%arg0: i32) -> (i32, i32, i32) {
    %c0_i32 = arith.constant 0 : i32
    %c0_i32_0 = arith.constant 0 : i32
    %c0_i32_1 = arith.constant 0 : i32
    return %arg0, %c0_i32, %c0_i32_0 : i32, i32, i32
  }
}

</mosaic_0001>

<bundles_post_ra>
// kernel: tpu_custom_call.1
= control target key start
LH: loop header
LB: loop body
LE: loop exit
PB: predicated region body
PF: predicated region fallthrough
CT: control target
= control target key end

     0   :  { %11 = vsyncpa [#allocation3], 0  ;;  %s1547_s0 = inlined_call_operand.vmem [shape: f32[2,8,32], index: 0, kind: input, shape index: {}]   ;;  %s1548_s1 = inlined_call_operand.vmem [shape: bf16[4,32,16], index: 1, kind: input, shape index: {}]   ;;  %s1549_s2 = inlined_call_operand.vmem [shape: bf16[4,32,16], index: 2, kind: input, shape index: {}]   ;;  %s1550_s3 = inlined_call_operand.vmem [shape: bf16[4,32,16], index: 3, kind: input, shape index: {}]   ;;  %s1551_s4 = inlined_call_operand.vmem [shape: bf16[4,16,32], index: 4, kind: input, shape index: {}]   ;;  %s1552_s5 = inlined_call_operand.vmem [shape: f32[1,32], index: 5, kind: input, shape index: {}]   ;;  %s1553_s6 = inlined_call_operand.hbm [shape: f32[2,8,32], index: 6, kind: output, shape index: {}]  }
   0x1   :  { %13 = vsyncpa [#allocation3 + $0x1], 0  ;;  %s1334_s21 = smov 0   ;;  %s1336_s22 = smov 0  }
   0x2   :  { %s1338_s23 = smov 0   ;;  %s1340_s24 = smov 0  }
   0x3 LB: > { %s1355_s25 = sadd.s32 4294967295, %s1297_s24   ;;  %s1005_s26 = sadd.s32 4294967294, %s1297_s24   ;;  %s1297_s24 = sphi %s1340_s24, %s1559_s24   ;;  %s1293_s23 = sphi %s1338_s23, %s1558_s23   ;;  %s1289_s22 = sphi %s1336_s22, %s1557_s22   ;;  %s1285_s21 = sphi %s1334_s21, %s1556_s21  }
   0x4   : > { %s1359_s27 = sadd.s32 1, %s1297_s24   ;;  %s157_s28 = sadd.s32 1, %s1293_s23 }
   0x5   : > { %s154_s29 = ssub.s32 %s1297_s24, %s1359_s27  ;;  %p167_p0 = scmp.ne.s32.totalorder %s1293_s23, %s1289_s22 }
   0x6   : > { %p155_p1 = scmp.eq.s32.totalorder %s154_s29, 0  ;;  %p168_p2 = scmp.eq.s32.totalorder %s1355_s25, 1 }
   0x7   : > { %p173_p3 = scmp.ne.s32.totalorder %s1289_s22, %s1285_s21  ;;  %p174_p4 = scmp.eq.s32.totalorder %s1005_s26, 1 }
   0x8   : > { %s1370_s30 = scalar_select %p155_p1, %s1293_s23, %s157_s28  }
   0x9   : > { %p1372_p5 = por %p168_p2, %p167_p0  ;;  %p1376_p6 = por %p174_p4, %p173_p3 }
   0xa   : > { %p1008_p7 = scmp.ge.s32.totalorder %s1297_s24, 1  ;;  %p214_p8 = scmp.lt.s32.totalorder %s1297_s24, 3 }
   0xc   : > { %p215_p9 = pnand %p1008_p7, %p214_p8 }
   0xd   : > { %p243_p10 = scmp.lt.s32.totalorder (!%p215_p9), %s1355_s25, 1  ;;  %s240_s10 = sand.u32 (!%p215_p9), 1, %s1289_s22  }
   0xe   : > { %218 = sbr.rel (%p215_p9) target bundleno = 857 (0x359), region = 44  ;;  %s1148_s12 = sshll.u32 (!%p215_p9), %s1355_s25, 3 }
   0xf   : > { %s941_s15 = scalar_lea.hbm (!%p215_p9), %s1553_s6, %s1148_s12  ;;  %s931_s20 = scalar_lea.sflag (!%p215_p9), [#allocation3], %s240_s10 }
  0x10   : > { %s945_s19 = sshll.u32 (!%p215_p9), %s941_s15, 4  ;;  %s946_s19 = int_to_ptr.hbm [resolvable:$true] %s945_s19 }
  0x13   : > { %v1152_v0 = vld [vmem:[%s1548_s1 + $0x8] sm:$0xff]  ;;  %v1154_v1 = vld [vmem:[%s1548_s1 + $0x18] sm:$0xff]  ;;  %v1151_v4 = vld [vmem:[%s1548_s1] sm:$0xff]  ;;  %s244_s26 = scalar_select %p243_p10, %s1355_s25, 1  ;;  %vm278_vm0 = vcmask 261120   ;;  %vm614_vm1 = vcmask 130048  }
  0x14   : > { %v1156_v2 = vld [vmem:[%s1548_s1 + $0x28] sm:$0xff]  ;;  %v1158_v3 = vld [vmem:[%s1548_s1 + $0x38] sm:$0xff]  ;;  %288 = vmatpush.bf16.msra.mxu0 %v1152_v0  ;;  %313 = vmatpush.bf16.msra.mxu1 %v1154_v1  ;;  %v1153_v5 = vld [vmem:[%s1548_s1 + $0x10] sm:$0xff]  ;;  %vm743_vm2 = vcmask 1043456   ;;  %vm691_vm3 = vcmask 64512  }
  0x15   : > { %338 = vmatpush.bf16.msra.mxu2 %v1156_v2  ;;  %363 = vmatpush.bf16.msra.mxu3 %v1158_v3  ;;  %v1155_v6 = vld [vmem:[%s1548_s1 + $0x20] sm:$0xff]  ;;  %v1157_v7 = vld [vmem:[%s1548_s1 + $0x30] sm:$0xff]  ;;  %s1010_s11 = sshll.u32 %s244_s26, 3  ;;  %v1160_v8 = vld [vmem:[%s1549_s2 + $0x8] sm:$0xff]  ;;  %s1249_s26 = sshra.s32 %s946_s19, 4  ;;  %s1250_s26 = int_to_ptr.hbm [resolvable:$true] %s1249_s26 }
  0x16   : > { %v1162_v9 = vld [vmem:[%s1549_s2 + $0x18] sm:$0xff]  ;;  %s246_s18 = scalar_lea.vmem %s1547_s0, %s1010_s11  ;;  %v1164_v12 = vld [vmem:[%s1549_s2 + $0x28] sm:$0xff]  ;;  %v1159_v14 = vld [vmem:[%s1549_s2] sm:$0xff]  ;;  %s1009_s11 = sshll.u32 %s240_s10, 3 }
  0x17   : > { %v248_v10 = vld [vmem:[%s246_s18] sm:$0xff]  ;;  %v1166_v13 = vld [vmem:[%s1549_s2 + $0x38] sm:$0xff]  ;;  %v1161_v15 = vld [vmem:[%s1549_s2 + $0x10] sm:$0xff]  ;;  %s242_s25 = scalar_lea.vmem [#allocation2], %s1009_s11  ;;  %s1251_s28 = scalar_lea.hbm %s1250_s26, 8 }
  0x18   : > { %289 = vmatpush.bf16.msra.mxu0 %v1151_v4  ;;  %314 = vmatpush.bf16.msra.mxu1 %v1153_v5  ;;  %v249_v11 = vpack.c.bf16 %v248_v10, %v248_v10  ;;  %v1163_v16 = vld [vmem:[%s1549_s2 + $0x20] sm:$0xff]  ;;  %v1165_v17 = vld [vmem:[%s1549_s2 + $0x30] sm:$0xff]  ;;  %v1168_v18 = vld [vmem:[%s1550_s3 + $0x8] sm:$0xff]  ;;  %s943_s18 = sshll.u32 %s242_s25, 4  ;;  %p1252_p11 = scmp.ne.s32.totalorder %s1250_s26, %s1251_s28  ;;  %s944_s18 = int_to_ptr.vmem [resolvable:$true] %s943_s18 }
  0x19   : > { %339 = vmatpush.bf16.msra.mxu2 %v1155_v6  ;;  %364 = vmatpush.bf16.msra.mxu3 %v1157_v7  ;;  %v1170_v19 = vld [vmem:[%s1550_s3 + $0x18] sm:$0xff]  ;;  %v1172_v20 = vld [vmem:[%s1550_s3 + $0x28] sm:$0xff]  ;;  %v1171_v21 = vld [vmem:[%s1550_s3 + $0x20] sm:$0xff]  ;;  %s1255_s11 = scalar_lea.hbm %s1553_s6, 16  ;;  %p1256_p0 = scmp.lt.s32.totalorder %s1250_s26, %s1553_s6 }
  0x1a   : > { %v1167_v22 = vld [vmem:[%s1550_s3] sm:$0xff]  ;;  %v1169_v23 = vld [vmem:[%s1550_s3 + $0x10] sm:$0xff]  ;;  %v1174_v24 = vld [vmem:[%s1550_s3 + $0x38] sm:$0xff]  ;;  %p1253_p12 = pnand %p1252_p11, %p1372_p5  ;;  %p1257_p1 = scmp.lt.s32.totalorder %s1255_s11, %s1251_s28 }
  0x1b   : > { %1019 = vmatmul.msk.bf16.vlgmr.msra.gmra.mxu0 %vm278_vm0, %v249_v11  ;;  %1028 = vmatmul.msk.bf16.vlgmr.msra.gmra.mxu1 %vm278_vm0, %v249_v11  ;;  %v1173_v25 = vld [vmem:[%s1550_s3 + $0x30] sm:$0xff] }
  0x1c   : > { %408 = vmatpush.bf16.msrb.mxu0 %v1160_v8  ;;  %433 = vmatpush.bf16.msrb.mxu1 %v1162_v9  ;;  %p1254_p13 = pneg %p1253_p12  ;;  %p1258_p2 = por %p1257_p1, %p1256_p0 }
  0x1d   : > { %1037 = vmatmul.msk.bf16.vlgmr.msra.gmra.mxu2 %vm278_vm0, %v249_v11  ;;  %1046 = vmatmul.msk.bf16.vlgmr.msra.gmra.mxu3 %vm278_vm0, %v249_v11 }
  0x1e   : > { %458 = vmatpush.bf16.msrb.mxu2 %v1164_v12  ;;  %483 = vmatpush.bf16.msrb.mxu3 %v1166_v13  ;;  %p1259_p3 = pnand %p1258_p2, %p1254_p13 }
  0x20   : > { %409 = vmatpush.bf16.msrb.mxu0 %v1159_v14  ;;  %434 = vmatpush.bf16.msrb.mxu1 %v1161_v15 }
  0x22   : > { %459 = vmatpush.bf16.msrb.mxu2 %v1163_v16  ;;  %484 = vmatpush.bf16.msrb.mxu3 %v1165_v17 }
  0x24   : > { %528 = vmatpush.bf16.msra.mxu0 %v1168_v18  ;;  %553 = vmatpush.bf16.msra.mxu1 %v1170_v19 }
  0x26   : > { %578 = vmatpush.bf16.msra.mxu2 %v1172_v20  ;;  %603 = vmatpush.bf16.msra.mxu3 %v1174_v24 }
  0x28   : > { %529 = vmatpush.bf16.msra.mxu0 %v1167_v22  ;;  %554 = vmatpush.bf16.msra.mxu1 %v1169_v23 }
  0x2a   : > { %579 = vmatpush.bf16.msra.mxu2 %v1171_v21  ;;  %604 = vmatpush.bf16.msra.mxu3 %v1173_v25 }
  0x2b   : > { %1055 = vmatmul.msk.bf16.vlgmr.msrb.gmra.mxu0 %vm278_vm0, %v249_v11  ;;  %1064 = vmatmul.msk.bf16.vlgmr.msrb.gmra.mxu1 %vm278_vm0, %v249_v11 }
  0x2d   : > { %1073 = vmatmul.msk.bf16.vlgmr.msrb.gmra.mxu2 %vm278_vm0, %v249_v11  ;;  %1082 = vmatmul.msk.bf16.vlgmr.msrb.gmra.mxu3 %vm278_vm0, %v249_v11 }
  0x3b   : > { %1091 = vmatmul.msk.bf16.vlgmr.msra.gmra.mxu0 %vm278_vm0, %v249_v11  ;;  %1100 = vmatmul.msk.bf16.vlgmr.msra.gmra.mxu1 %vm278_vm0, %v249_v11 }
  0x3d   : > { %1109 = vmatmul.msk.bf16.vlgmr.msra.gmra.mxu2 %vm278_vm0, %v249_v11  ;;  %1118 = vmatmul.msk.bf16.vlgmr.msra.gmra.mxu3 %vm278_vm0, %v249_v11 }
  0x98   : > { %v291_v26 = vpop.f32.mrf.mxu0  ;;  %v316_v27 = vpop.f32.mrf.mxu1 }
  0x99   : > { %v371_v42 = vpack.c.bf16 %v316_v27, %v316_v27  ;;  %v370_v47 = vpack.c.bf16 %v291_v26, %v291_v26 }
  0xa0   : > { %v341_v28 = vpop.f32.mrf.mxu2  ;;  %v366_v29 = vpop.f32.mrf.mxu3 }
  0xa1   : > { %v293_v30 = vpop.f32.mrf.mxu0  ;;  %v318_v31 = vpop.f32.mrf.mxu1  ;;  %v372_v52 = vpack.c.bf16 %v341_v28, %v341_v28  ;;  %v373_v53 = vpack.c.bf16 %v366_v29, %v366_v29 }
  0xa8   : > { %v343_v32 = vpop.f32.mrf.mxu2  ;;  %v368_v33 = vpop.f32.mrf.mxu3 }
  0xa9   : > { %v411_v34 = vpop.f32.mrf.mxu0  ;;  %v436_v35 = vpop.f32.mrf.mxu1 }
  0xaa   : > { %v490_v36 = vpack.c.bf16 %v411_v34, %v411_v34  ;;  %v491_v37 = vpack.c.bf16 %v436_v35, %v436_v35 }
  0xac   : > { %v619_v38 = vsel %vm614_vm1, %v490_v36, 0  ;;  %v638_v39 = vsel %vm614_vm1, %v491_v37, 0 }
  0xad   : > { %628 = vmatpush.bf16.xpose.msrb.mxu0 %v619_v38  ;;  %647 = vmatpush.bf16.xpose.msrb.mxu1 %v638_v39 }
  0xb0   : > { %v461_v40 = vpop.f32.mrf.mxu2  ;;  %v486_v41 = vpop.f32.mrf.mxu3 }
  0xb1   : > { %v492_v43 = vpack.c.bf16 %v461_v40, %v461_v40  ;;  %v493_v44 = vpack.c.bf16 %v486_v41, %v486_v41  ;;  %v413_v45 = vpop.f32.mrf.mxu0  ;;  %v438_v46 = vpop.f32.mrf.mxu1 }
  0xb3   : > { %v657_v48 = vsel %vm614_vm1, %v492_v43, 0  ;;  %v676_v49 = vsel %vm614_vm1, %v493_v44, 0 }
  0xb4   : > { %666 = vmatpush.bf16.xpose.msrb.mxu2 %v657_v48  ;;  %685 = vmatpush.bf16.xpose.msrb.mxu3 %v676_v49 }
  0xb5   : > { %1119 = vmatmul.msk.bf16.vlgmr.msrb.gmra.mxu0 %vm614_vm1, %v370_v47  ;;  %1120 = vmatmul.msk.bf16.vlgmr.msrb.gmra.mxu1 %vm614_vm1, %v371_v42 }
  0xb8   : > { %v463_v50 = vpop.f32.mrf.mxu2  ;;  %v488_v51 = vpop.f32.mrf.mxu3 }
  0xb9   : > { %v531_v54 = vpop.f32.mrf.mxu0  ;;  %v556_v55 = vpop.f32.mrf.mxu1 }
  0xba   : > { %v610_v56 = vpack.c.bf16 %v531_v54, %v531_v54  ;;  %v611_v57 = vpack.c.bf16 %v556_v55, %v556_v55  ;;  %v1175_v54 = vld [vmem:[%s1551_s4] sm:$0xff]  ;;  %v1176_v55 = vld [vmem:[%s1551_s4 + $0x8] sm:$0xff] }
  0xbb   : > { %1121 = vmatmul.msk.bf16.vlgmr.msrb.gmra.mxu2 %vm614_vm1, %v372_v52  ;;  %1122 = vmatmul.msk.bf16.vlgmr.msrb.gmra.mxu3 %vm614_vm1, %v373_v53 }
  0xbc   : > { %v745_v58 = vsel %vm743_vm2, %v610_v56, 0  ;;  %v764_v59 = vsel %vm743_vm2, %v611_v57, 0  ;;  %v1177_v56 = vld [vmem:[%s1551_s4 + $0x10] sm:$0xff]  ;;  %v1178_v57 = vld [vmem:[%s1551_s4 + $0x18] sm:$0xff] }
  0xbd   : > { %754 = vmatpush.bf16.msra.mxu0 %v745_v58  ;;  %773 = vmatpush.bf16.msra.mxu1 %v764_v59 }
  0xc0   : > { %v581_v60 = vpop.f32.mrf.mxu2  ;;  %v606_v1 = vpop.f32.mrf.mxu3 }
  0xc1   : > { %v612_v61 = vpack.c.bf16 %v581_v60, %v581_v60  ;;  %v533_v62 = vpop.f32.mrf.mxu0  ;;  %v558_v63 = vpop.f32.mrf.mxu1  ;;  %v613_v2 = vpack.c.bf16 %v606_v1, %v606_v1  ;;  %845 = vmatpush.bf16.msrb.mxu0 %v1175_v54  ;;  %867 = vmatpush.bf16.msrb.mxu1 %v1176_v55 }
  0xc3   : > { %v783_v0 = vsel %vm743_vm2, %v612_v61, 0  ;;  %v802_v4 = vsel %vm743_vm2, %v613_v2, 0 }
  0xc4   : > { %792 = vmatpush.bf16.msra.mxu2 %v783_v0  ;;  %811 = vmatpush.bf16.msra.mxu3 %v802_v4 }
  0xc8   : > { %v583_v3 = vpop.f32.mrf.mxu2  ;;  %v608_v5 = vpop.f32.mrf.mxu3  ;;  %889 = vmatpush.bf16.msrb.mxu2 %v1177_v56  ;;  %911 = vmatpush.bf16.msrb.mxu3 %v1178_v57 }
 0x132   : > { %v630_v6 = vpop.f32.mrf.mxu0  ;;  %v649_v7 = vpop.f32.mrf.mxu1 }
 0x133   : > { %v692_v8 = vsel %vm691_vm3, %v630_v6, -inf  ;;  %v695_v11 = vsel %vm691_vm3, %v649_v7, -inf }
 0x134   : > { %693 = vmax.xlane.f32.xlu1 %v692_v8 }
 0x13a   : > { %v632_v9 = vpop.f32.mrf.mxu0  ;;  %v651_v10 = vpop.f32.mrf.mxu1 }
 0x13c   : > { %696 = vmax.xlane.f32.xlu1 %v695_v11 }
 0x13e   : > { %v668_v12 = vpop.f32.mrf.mxu2  ;;  %v687_v13 = vpop.f32.mrf.mxu3 }
 0x13f   : > { %v698_v14 = vsel %vm691_vm3, %v668_v12, -inf  ;;  %v701_v17 = vsel %vm691_vm3, %v687_v13, -inf }
 0x140   : > { %699 = vmax.xlane.f32.xlu0 %v698_v14 }
 0x146   : > { %v670_v15 = vpop.f32.mrf.mxu2  ;;  %v689_v16 = vpop.f32.mrf.mxu3 }
 0x148   : > { %702 = vmax.xlane.f32.xlu0 %v701_v17 }
 0x1a7   : > { %v694_v18 = vpop.xlane.xlu1 %693 }
 0x1a8   : > { %v704_v19 = vsub.f32 %v630_v6, %v694_v18  ;;  %v1218_v18 = vld [vmem:[%s1552_s5] ss:$0 sm:$0xff] }
 0x1aa   : > { %v708_v20 = vmul.f32 1.442695, %v704_v19 }
 0x1ac   : > { %1219 = vpow2.f32 %v708_v20 }
 0x1af   : > { %v697_v21 = vpop.xlane.xlu1 %696 }
 0x1b0   : > { %v705_v22 = vsub.f32 %v649_v7, %v697_v21 }
 0x1b2   : > { %v1220_v23 = vpop.eup %1219  ;;  %v710_v24 = vmul.f32 1.442695, %v705_v22 }
 0x1b3   : > { %v700_v25 = vpop.xlane.xlu0 %699  ;;  %v716_v26 = vsel %vm691_vm3, %v1220_v23, 0.0 }
 0x1b4   : > { %1221 = vpow2.f32 %v710_v24  ;;  %v706_v27 = vsub.f32 %v668_v12, %v700_v25  ;;  %717 = vadd.xlane.f32.xlu0 %v716_v26 }
 0x1b6   : > { %v712_v28 = vmul.f32 1.442695, %v706_v27 }
 0x1b8   : > { %1223 = vpow2.f32 %v712_v28 }
 0x1ba   : > { %v1222_v29 = vpop.eup %1221 }
 0x1bb   : > { %v703_v30 = vpop.xlane.xlu0 %702  ;;  %v719_v31 = vsel %vm691_vm3, %v1222_v29, 0.0 }
 0x1bc   : > { %v707_v32 = vsub.f32 %v687_v13, %v703_v30  ;;  %720 = vadd.xlane.f32.xlu1 %v719_v31 }
 0x1be   : > { %v1224_v33 = vpop.eup %1223  ;;  %v714_v34 = vmul.f32 1.442695, %v707_v32 }
 0x1bf   : > { %v722_v35 = vsel %vm691_vm3, %v1224_v33, 0.0 }
 0x1c0   : > { %1225 = vpow2.f32 %v714_v34  ;;  %723 = vadd.xlane.f32.xlu2 %v722_v35 }
 0x1c6   : > { %v1226_v36 = vpop.eup %1225 }
 0x1c7   : > { %v725_v37 = vsel %vm691_vm3, %v1226_v36, 0.0 }
 0x1c8   : > { %726 = vadd.xlane.f32.xlu2 %v725_v37 }
 0x227   : > { %v718_v38 = vpop.xlane.xlu0 %717 }
 0x228   : > { %1227 = vrcp.f32 %v718_v38 }
 0x22e   : > { %v1228_v39 = vpop.eup %1227 }
 0x22f   : > { %v732_v40 = vmul.f32 %v1228_v39, %v1220_v23  ;;  %v721_v41 = vpop.xlane.xlu1 %720 }
 0x230   : > { %1229 = vrcp.f32 %v721_v41 }
 0x231   : > { %v736_v42 = vpack.c.bf16 %v732_v40, %v732_v40 }
 0x233   : > { %v724_v43 = vpop.xlane.xlu2 %723  ;;  %1123 = vmatmul.msk.bf16.vlgmr.msra.gmra.mxu0 %vm691_vm3, %v736_v42 }
 0x234   : > { %1231 = vrcp.f32 %v724_v43 }
 0x236   : > { %v1230_v44 = vpop.eup %1229 }
 0x237   : > { %v733_v45 = vmul.f32 %v1230_v44, %v1222_v29 }
 0x239   : > { %v737_v46 = vpack.c.bf16 %v733_v45, %v733_v45 }
 0x23a   : > { %v1232_v47 = vpop.eup %1231 }
 0x23b   : > { %v734_v48 = vmul.f32 %v1232_v47, %v1224_v33  ;;  %v727_v49 = vpop.xlane.xlu2 %726  ;;  %1124 = vmatmul.msk.bf16.vlgmr.msra.gmra.mxu1 %vm691_vm3, %v737_v46 }
 0x23c   : > { %1233 = vrcp.f32 %v727_v49 }
 0x23d   : > { %v738_v50 = vpack.c.bf16 %v734_v48, %v734_v48 }
 0x23f   : > { %1125 = vmatmul.msk.bf16.vlgmr.msra.gmra.mxu2 %vm691_vm3, %v738_v50 }
 0x242   : > { %v1234_v51 = vpop.eup %1233 }
 0x243   : > { %v735_v52 = vmul.f32 %v1234_v51, %v1226_v36 }
 0x245   : > { %v739_v53 = vpack.c.bf16 %v735_v52, %v735_v52 }
 0x247   : > { %1126 = vmatmul.msk.bf16.vlgmr.msra.gmra.mxu3 %vm691_vm3, %v739_v53 }
 0x2b0   : > { %v756_v58 = vpop.f32.mrf.mxu0 }
 0x2b1   : > { %v817_v59 = vpack.c.bf16 %v756_v58, %v756_v58 }
 0x2b3   : > { %1131 = vmatmul.msk.bf16.vlgmr.msrb.gmra.mxu0 %vm614_vm1, %v817_v59 }
 0x2b8   : > { %v758_v60 = vpop.f32.mrf.mxu0  ;;  %v775_v61 = vpop.f32.mrf.mxu1 }
 0x2b9   : > { %v818_v62 = vpack.c.bf16 %v775_v61, %v775_v61 }
 0x2bb   : > { %1136 = vmatmul.msk.bf16.vlgmr.msrb.gmra.mxu1 %vm614_vm1, %v818_v62 }
 0x2c0   : > { %v777_v63 = vpop.f32.mrf.mxu1 }
 0x2c2   : > { %v794_v0 = vpop.f32.mrf.mxu2 }
 0x2c3   : > { %v819_v1 = vpack.c.bf16 %v794_v0, %v794_v0 }
 0x2c5   : > { %1141 = vmatmul.msk.bf16.vlgmr.msrb.gmra.mxu2 %vm614_vm1, %v819_v1 }
 0x2ca   : > { %v796_v2 = vpop.f32.mrf.mxu2  ;;  %v813_v3 = vpop.f32.mrf.mxu3 }
 0x2cb   : > { %v820_v4 = vpack.c.bf16 %v813_v3, %v813_v3 }
 0x2cd   : > { %1146 = vmatmul.msk.bf16.vlgmr.msrb.gmra.mxu3 %vm614_vm1, %v820_v4 }
 0x2d2   : > { %v815_v5 = vpop.f32.mrf.mxu3 }
 0x330   : > { %v847_v6 = vpop.f32.mrf.mxu0 }
 0x331   : > { %v917_v12 = vsel %vm278_vm0, %v847_v6, 0.0 }
 0x338   : > { %v849_v7 = vpop.f32.mrf.mxu0  ;;  %v869_v8 = vpop.f32.mrf.mxu1 }
 0x339   : > { %v918_v11 = vsel %vm278_vm0, %v869_v8, 0.0 }
 0x33a   : > { %v919_v14 = vadd.f32 %v918_v11, %v917_v12 }
 0x340   : > { %v871_v9 = vpop.f32.mrf.mxu1 }
 0x348   : > { %v891_v10 = vpop.f32.mrf.mxu2 }
 0x349   : > { %v920_v13 = vsel %vm278_vm0, %v891_v10, 0.0 }
 0x34a   : > { %v921_v15 = vadd.f32 %v920_v13, %v919_v14 }
 0x350   : > { %v893_v16 = vpop.f32.mrf.mxu2  ;;  %v913_v17 = vpop.f32.mrf.mxu3 }
 0x351   : > { %v922_v19 = vsel %vm278_vm0, %v913_v17, 0.0 }
 0x352   : > { %v923_v20 = vadd.f32 %v922_v19, %v921_v15 }
 0x354   : > { %v928_v21 = vadd.f32 %v1218_v18, %v923_v20 }
 0x356   : > { %929 = vst.msk [vmem:[%s242_s25] sm:$0xff] %vm278_vm0, %v928_v21 }
 0x357   : > { %1262 = shalt.err (!%p1259_p3)
}
 0x358   : > { %1179 = dma.vmem_to_hbm [thread:$0]  (%p1372_p5), %s944_s18, 128, %s946_s19, %s931_s20   ;;  %v915_v22 = vpop.f32.mrf.mxu3 }
 0x359 PF: > { %p1185_p4 = scmp.ge.s32.totalorder %s1297_s24, 2  ;;  %s957_s10 = sand.u32 1, %s1285_s21  }
 0x35a   : > { %s958_s14 = scalar_lea.sflag [#allocation3], %s957_s10 }
 0x35b   : > { %p1182_p7 = pnand %p1185_p4, %p1376_p6 }
 0x35d   : > { %p1183_p8 = pneg %p1182_p7 }
 0x35f   : > { %1280 = dma.done.wait (%p1183_p8), %s958_s14, 128  }
 0x360   : > { %1282 = vsyncadd (%p1183_p8), %s958_s14, 4294967168  ;;  %p16_p9 = scmp.ge.s32.totalorder %s1359_s27, 4   ;;  %s1556_s21 = smov %s1289_s22 }
 0x361   : > { %s1557_s22 = smov %s1293_s23  ;;  %s1558_s23 = smov %s1370_s30 }
 0x362   : > { %s1559_s24 = smov %s1359_s27  ;;  %18 = sbr.rel (!%p16_p9) target bundleno = 3 (0x3), region = 79 }
 0x367   :  { %964 = vsyncpa [#allocation3], 1 }
 0x368   :  { %966 = vsyncpa [#allocation3 + $0x1], 1 }

</bundles_post_ra>
